<compile_context>
chip_gen: v7x
topology: tpu7x:2x2x1
jax: 0.10.0
libtpu: 0.0.40
codegen_flags: <defaults>
</compile_context>

<pallas_src>
import jax
import jax.numpy as jnp
from jax.experimental import pallas as pl
from jax.experimental.pallas import tpu as pltpu

OUT_LANES = 128  # lane-dense output slab width


def _round_up(x, m):
    return ((x + m - 1) // m) * m


def dqn_kernel(x_ref, w1_ref, b1_ref, w2_ref, b2_ref, o_ref):
    # Layer 1 on the MXU: bf16 inputs, f32 accumulation.
    h = jnp.dot(x_ref[...], w1_ref[...], preferred_element_type=jnp.float32)
    h = jnp.maximum(h + b1_ref[...], 0.0)                     # (TB, 64) f32, relu_
    # Layer 2 (out_features=1) on the VPU/XLU: broadcast-mul + lane reduce.
    q = jnp.sum(h * w2_ref[...], axis=-1, keepdims=True)      # (TB, 1)
    q = q + b2_ref[0]                                         # scalar bias from SMEM
    # Lane-dense store: replicate the per-row scalar across 128 lanes (unmasked vst).
    o_ref[...] = jnp.broadcast_to(q, o_ref.shape).astype(o_ref.dtype)


def dqn_forward(x, w1, b1, w2, b2, *, block_b=512):
    """x: (B, dim) f32; w1: (dim, 64); b1: (64,); w2: (64, 1); b2: (1,)."""
    B, dim = x.shape
    l1 = w1.shape[1]

    # Halve HBM traffic on the streamed operand + resident weight; accumulate in f32.
    x_bf = x.astype(jnp.bfloat16)
    w1_bf = w1.astype(jnp.bfloat16)

    # Batch tile: multiple of 8 sublanes, capped so 2x(x tile)+2x(out tile) stays small
    # even under v7x's 64 MiB physical / 32 MiB scoped VMEM.
    TB = min(block_b, _round_up(B, 8))
    TB = max(8, (TB // 8) * 8)
    Bp = _round_up(B, TB)
    if Bp != B:
        x_bf = jnp.pad(x_bf, ((0, Bp - B), (0, 0)))

    b1_2d = b1.reshape(1, l1).astype(jnp.float32)
    w2_row = w2.reshape(1, l1).astype(jnp.float32)   # (1, 64) row for the VPU reduce
    b2_1d = b2.reshape(1).astype(jnp.float32)        # scalar bias -> SMEM

    # Scoped-VMEM budget: double-buffered x + out tiles, resident weights, headroom.
    tile_bytes = 2 * (TB * dim * 2 + TB * OUT_LANES * 4)
    weight_bytes = dim * l1 * 2 + 3 * l1 * 4
    vmem_limit = min(max(tile_bytes + weight_bytes + (1 << 20), 4 << 20), 32 << 20)

    grid = (Bp // TB,)
    out = pl.pallas_call(
        dqn_kernel,
        out_shape=jax.ShapeDtypeStruct((Bp, OUT_LANES), jnp.float32),
        grid_spec=pltpu.PrefetchScalarGridSpec(
            num_scalar_prefetch=0,
            grid=grid,
            in_specs=[
                pl.BlockSpec((TB, dim), lambda i: (i, 0)),     # x: streamed per tile
                pl.BlockSpec((dim, l1), lambda i: (0, 0)),     # W1: VMEM-resident
                pl.BlockSpec((1, l1), lambda i: (0, 0)),       # b1: VMEM-resident
                pl.BlockSpec((1, l1), lambda i: (0, 0)),       # W2 row: VMEM-resident
                pl.BlockSpec(memory_space=pltpu.MemorySpace.SMEM),  # b2 scalar
            ],
            out_specs=pl.BlockSpec((TB, OUT_LANES), lambda i: (i, 0)),
        ),
        compiler_params=pltpu.CompilerParams(
            dimension_semantics=("parallel",),
            vmem_limit_bytes=vmem_limit,
        ),
    )(x_bf, w1_bf, b1_2d, w2_row, b2_1d)

    # Module semantics: (B, 1) Q-values.
    return out[:B, :1]


def init_params(key, dim, l1=64):
    """Deterministic init mimicking nn.Linear default (uniform +/- 1/sqrt(fan_in))."""
    k1, k2, k3, k4 = jax.random.split(key, 4)
    bound1 = 1.0 / jnp.sqrt(dim)
    bound2 = 1.0 / jnp.sqrt(l1)
    # Stored pre-transposed as (in, out); equivalent to PyTorch's (out, in).T
    w1 = jax.random.uniform(k1, (dim, l1), jnp.float32, -bound1, bound1)
    b1 = jax.random.uniform(k2, (l1,), jnp.float32, -bound1, bound1)
    w2 = jax.random.uniform(k3, (l1, 1), jnp.float32, -bound2, bound2)
    b2 = jax.random.uniform(k4, (1,), jnp.float32, -bound2, bound2)
    return w1, b1, w2, b2


if __name__ == "__main__":
    key = jax.random.PRNGKey(0)
    kx, kp = jax.random.split(key)

    B, dim = 8, 16  # small shapes consistent with DQN(dim) forward on (B, dim) input
    x = jax.random.normal(kx, (B, dim), jnp.float32)
    w1, b1, w2, b2 = init_params(kp, dim)

    out = dqn_forward(x, w1, b1, w2, b2)
    out = jax.block_until_ready(out)

    # Pure-JAX reference (emulating the kernel's bf16 input cast, f32 accumulate).
    xb = x.astype(jnp.bfloat16).astype(jnp.float32)
    w1b = w1.astype(jnp.bfloat16).astype(jnp.float32)
    h_ref = jnp.maximum(xb @ w1b + b1, 0.0)
    ref = (h_ref * w2.reshape(1, -1)).sum(-1, keepdims=True) + b2

    assert out.shape == (B, 1)
    assert jnp.allclose(out, ref, atol=1e-4, rtol=1e-4)

    print("KERNEL_OK")
</pallas_src>

<mosaic_0001>
module attributes {stable_mosaic.version = 11 : i64} {
  func.func @dqn_kernel(%arg0: i32, %arg1: memref<8x16xbf16, #tpu.memory_space<vmem>>, %arg2: memref<16x64xbf16, #tpu.memory_space<vmem>>, %arg3: memref<1x64xf32, #tpu.memory_space<vmem>>, %arg4: memref<1x64xf32, #tpu.memory_space<vmem>>, %arg5: memref<1xf32, #tpu.memory_space<smem>>, %arg6: memref<8x128xf32, #tpu.memory_space<vmem>>) attributes {dimension_semantics = [#tpu.dimension_semantics<parallel>], iteration_bounds = array<i64: 1>, scalar_prefetch = 0 : i64, scratch_operands = 0 : i64, tpu.core_type = #tpu.core_type<tc>, window_params = [{transform_indices = @transform_0, window_bounds = array<i64: 8, 16>}, {pipeline_mode = #tpu.pipeline_mode<synchronous>, transform_indices = @transform_1, window_bounds = array<i64: 16, 64>}, {pipeline_mode = #tpu.pipeline_mode<synchronous>, transform_indices = @transform_2, window_bounds = array<i64: 1, 64>}, {pipeline_mode = #tpu.pipeline_mode<synchronous>, transform_indices = @transform_3, window_bounds = array<i64: 1, 64>}, {transform_indices = @transform_4, window_bounds = array<i64: 1>}, {transform_indices = @transform_5, window_bounds = array<i64: 8, 128>}]} {
    %c0 = arith.constant 0 : index
    %c0_0 = arith.constant 0 : index
    %0 = vector.load %arg1[%c0, %c0_0] : memref<8x16xbf16, #tpu.memory_space<vmem>>, vector<8x16xbf16>
    %c0_1 = arith.constant 0 : index
    %c0_2 = arith.constant 0 : index
    %1 = vector.load %arg2[%c0_1, %c0_2] : memref<16x64xbf16, #tpu.memory_space<vmem>>, vector<16x64xbf16>
    %cst = arith.constant dense<0.000000e+00> : vector<8x64xf32>
    %2 = tpu.matmul %0, %1, %cst {dimension_numbers = #tpu.dot_dimension_numbers<[1], [0], [0], [1], [0, 0, 1, 1], [], []>} : vector<8x16xbf16>, vector<16x64xbf16>, vector<8x64xf32> -> vector<8x64xf32>
    %c0_3 = arith.constant 0 : index
    %c0_4 = arith.constant 0 : index
    %3 = vector.load %arg3[%c0_3, %c0_4] : memref<1x64xf32, #tpu.memory_space<vmem>>, vector<1x64xf32>
    %4 = vector.broadcast %3 : vector<1x64xf32> to vector<8x64xf32>
    %5 = arith.addf %2, %4 : vector<8x64xf32>
    %cst_5 = arith.constant 0.000000e+00 : f32
    %6 = vector.broadcast %cst_5 : f32 to vector<8x64xf32>
    %7 = arith.maximumf %5, %6 : vector<8x64xf32>
    %c0_6 = arith.constant 0 : index
    %c0_7 = arith.constant 0 : index
    %8 = vector.load %arg4[%c0_6, %c0_7] : memref<1x64xf32, #tpu.memory_space<vmem>>, vector<1x64xf32>
    %9 = vector.broadcast %8 : vector<1x64xf32> to vector<8x64xf32>
    %10 = arith.mulf %7, %9 : vector<8x64xf32>
    %cst_8 = arith.constant dense<0.000000e+00> : vector<8xf32>
    %11 = vector.multi_reduction <add>, %10, %cst_8 [1] : vector<8x64xf32> to vector<8xf32>
    %12 = vector.shape_cast %11 : vector<8xf32> to vector<8x1xf32>
    %c0_9 = arith.constant 0 : index
    %13 = memref.load %arg5[%c0_9] : memref<1xf32, #tpu.memory_space<smem>>
    %14 = vector.broadcast %13 : f32 to vector<8x1xf32>
    %15 = arith.addf %12, %14 : vector<8x1xf32>
    %16 = vector.shape_cast %15 : vector<8x1xf32> to vector<8x1xf32>
    %17 = vector.broadcast %16 : vector<8x1xf32> to vector<8x128xf32>
    %c0_10 = arith.constant 0 : index
    %c0_11 = arith.constant 0 : index
    %18 = vector.load %arg6[%c0_10, %c0_11] : memref<8x128xf32, #tpu.memory_space<vmem>>, vector<8x128xf32>
    tpu.vector_store %arg6[%c0_10, %c0_11], %17 {strides = array<i32>} : memref<8x128xf32, #tpu.memory_space<vmem>>, vector<8x128xf32>,
    return
  }
  func.func @transform_0(%arg0: i32) -> (i32, i32) {
    %c0_i32 = arith.constant 0 : i32
    %c0_i32_0 = arith.constant 0 : i32
    return %arg0, %c0_i32 : i32, i32
  }
  func.func @transform_1(%arg0: i32) -> (i32, i32) {
    %c0_i32 = arith.constant 0 : i32
    %c0_i32_0 = arith.constant 0 : i32
    %c0_i32_1 = arith.constant 0 : i32
    return %c0_i32, %c0_i32_0 : i32, i32
  }
  func.func @transform_2(%arg0: i32) -> (i32, i32) {
    %c0_i32 = arith.constant 0 : i32
    %c0_i32_0 = arith.constant 0 : i32
    %c0_i32_1 = arith.constant 0 : i32
    return %c0_i32, %c0_i32_0 : i32, i32
  }
  func.func @transform_3(%arg0: i32) -> (i32, i32) {
    %c0_i32 = arith.constant 0 : i32
    %c0_i32_0 = arith.constant 0 : i32
    %c0_i32_1 = arith.constant 0 : i32
    return %c0_i32, %c0_i32_0 : i32, i32
  }
  func.func @transform_4(%arg0: i32) -> i32 {
    %c0_i32 = arith.constant 0 : i32
    %c0_i32_0 = arith.constant 0 : i32
    return %c0_i32 : i32
  }
  func.func @transform_5(%arg0: i32) -> (i32, i32) {
    %c0_i32 = arith.constant 0 : i32
    %c0_i32_0 = arith.constant 0 : i32
    return %arg0, %c0_i32 : i32, i32
  }
}

</mosaic_0001>

<bundles_post_ra>
// kernel: tpu_custom_call.1
= control target key start
LH: loop header
LB: loop body
LE: loop exit
PB: predicated region body
PF: predicated region fallthrough
CT: control target
= control target key end

     0   :  { %11 = vsyncpa [#allocation4], 0  ;;  %s323_s0 = inlined_call_operand.hbm [shape: bf16[8,16], index: 0, kind: input, shape index: {}]   ;;  %s324_s1 = inlined_call_operand.hbm [shape: bf16[16,64], index: 1, kind: input, shape index: {}]   ;;  %s325_s2 = inlined_call_operand.vmem [shape: f32[1,64], index: 2, kind: input, shape index: {}]   ;;  %s326_s3 = inlined_call_operand.vmem [shape: f32[1,64], index: 3, kind: input, shape index: {}]   ;;  %s327_s4 = inlined_call_operand.<no memory space> [shape: f32[1], index: 4, kind: input, shape index: {}]   ;;  %s328_s5 = inlined_call_operand.hbm [shape: f32[8,128], index: 5, kind: output, shape index: {}]  }
   0x1   :  { %12 = vsyncpa [#allocation7], 0 }
   0x2   :  { %13 = vsyncpa [#allocation5], 0  ;;  %s234_s18 = smov [#allocation3]   ;;  %s235_s20 = smov [#allocation6]  }
   0x3   :  { %s20_s19 = sshll.u32 %s234_s18, 4  ;;  %s29_s21 = sshll.u32 %s235_s20, 4  ;;  %s21_s19 = int_to_ptr.vmem [resolvable:$true] %s20_s19  ;;  %s271_s21 = int_to_ptr.vmem [resolvable:$true] %s29_s21 }
   0x4   :  { %s162_s24 = scalar_lea.hbm %s323_s0, 64 }
   0x5   :  { %p163_p0 = scmp.ne.s32.totalorder %s323_s0, %s162_s24  ;;  %p166_p1 = scmp.lt.u32.totalorder %s162_s24, %s323_s0 }
   0x7   :  { %p168_p2 = pnand %p166_p1, %p163_p0 }
   0x9   :  { %171 = shalt.err (!%p168_p2)
}
   0xa   :  { %s172_s29 = scalar_lea.vmem %s21_s19, 64  ;;  %p177_p4 = scmp.lt.s32.totalorder %s21_s19, %s21_s19 }
   0xb   :  { %p173_p3 = scmp.ne.s32.totalorder %s21_s19, %s172_s29  ;;  %p178_p5 = scmp.lt.s32.totalorder %s172_s29, %s172_s29 }
   0xd   :  { %p179_p6 = por %p178_p5, %p177_p4 }
   0xf   :  { %p180_p7 = pnand %p179_p6, %p173_p3 }
  0x11   :  { %183 = shalt.err (!%p180_p7)
}
  0x12   :  { %23 = dma.hbm_to_vmem [thread:$0]  %s323_s0, 64, %s21_s19, [#allocation4]  }
  0x13   :  { %s184_s9 = scalar_lea.hbm %s324_s1, 128 }
  0x14   :  { %p185_p8 = scmp.ne.s32.totalorder %s324_s1, %s184_s9  ;;  %p188_p9 = scmp.lt.u32.totalorder %s184_s9, %s324_s1 }
  0x16   :  { %p190_p10 = pnand %p188_p9, %p185_p8 }
  0x18   :  { %193 = shalt.err (!%p190_p10)
}
  0x19   :  { %s194_s14 = scalar_lea.vmem %s271_s21, 128  ;;  %p199_p12 = scmp.lt.s32.totalorder %s271_s21, %s271_s21 }
  0x1a   :  { %p195_p11 = scmp.ne.s32.totalorder %s271_s21, %s194_s14  ;;  %p200_p13 = scmp.lt.s32.totalorder %s194_s14, %s194_s14 }
  0x1c   :  { %p201_p0 = por %p200_p13, %p199_p12 }
  0x1e   :  { %p202_p1 = pnand %p201_p0, %p195_p11 }
  0x20   :  { %205 = shalt.err (!%p202_p1)
}
  0x21   :  { %s236_s0 = smov 64   ;;  %s237_s15 = smov 4  }
  0x22   :  { %35 = dma.hbm_to_vmem [thread:$0]  %s324_s1, 128, %s271_s21, [#allocation7], %s236_s0, %s236_s0, %s237_s15  }
  0x23   :  { %228 = dma.done.wait [#allocation4], 64  }
  0x24   :  { %229 = vsyncadd [#allocation4], 4294967232 }
  0x25   :  { %230 = dma.done.wait [#allocation7], 128  }
  0x26   :  { %231 = vsyncadd [#allocation7], 4294967168  ;;  %v238_v0 = vmov 0.0   ;;  %vm239_vm0 = vmmov 0   ;;  %v161_v1 = vld [vmem:[#allocation6] sm:$0xff]   ;;  %vm65_vm1 = vcmask 130048   ;;  %v123_v13 = vstv %s327_s4 }
  0x27   :  { %148 = vmatprep.subr.bf16.mxu0 %v238_v0  ;;  %150 = vmatprep.mubr.msk.bf16.mxu0 %vm239_vm0, %v238_v0  ;;  %v49_v2 = vld [vmem:[#allocation3] sm:$0xf]  ;;  %vm118_vm2 = vcmask 523264   ;;  %s240_s23 = smov [#allocation8]  }
  0x28   :  { %149 = vmatpush3.bf16.msra.mxu0 %v161_v1  ;;  %v142_v3 = vld [vmem:[%s325_s2] ss:$0 sm:$0xff]  ;;  %s132_s2 = sshll.u32 %s240_s23, 4  ;;  %s133_s2 = int_to_ptr.vmem [resolvable:$true] %s132_s2 }
  0x29   :  { %v145_v8 = vld [vmem:[%s326_s3] ss:$0 sm:$0xff]  ;;  %s206_s24 = scalar_lea.vmem %s133_s2, 128  ;;  %p211_p3 = scmp.lt.s32.totalorder %s133_s2, %s133_s2 }
  0x2a   :  { %p207_p2 = scmp.ne.s32.totalorder %s133_s2, %s206_s24  ;;  %p212_p4 = scmp.lt.s32.totalorder %s206_s24, %s206_s24 }
  0x2b   :  { %151 = vmatmul.mubr.msk.bf16.vlgmr.msra.gmra.mrb[0].mxu0 %vm65_vm1, %v49_v2 }
  0x2c   :  { %p213_p5 = por %p212_p4, %p211_p3 }
  0x2e   :  { %p214_p6 = pnand %p213_p5, %p207_p2 }
  0xfe   :  { %v103_v4 = vpop.f32.mrb[0].mxu0 }
  0xff   :  { %v104_v5 = vadd.f32 %v142_v3, %v103_v4  ;;  %v152_v6 = vpop.f32.mrb[1].mxu0 }
 0x100   :  { %v106_v7 = vpop.f32.mrb[2].mxu0 }
 0x101   :  { %v109_v9 = vmax.f32 %v104_v5, 0.0  ;;  %v153_v10 = vpop.f32.mrb[3].mxu0 }
 0x103   :  { %v117_v11 = vmul.f32 %v145_v8, %v109_v9 }
 0x105   :  { %v119_v12 = vsel %vm118_vm2, %v117_v11, 0.0 }
 0x106   :  { %120 = vadd.xlane.f32.xlu0 %v119_v12 }
 0x193   :  { %v121_v14 = vpop.xlane.xlu0 %120 }
 0x194   :  { %v124_v15 = vadd.f32 %v123_v13, %v121_v14 }
 0x196   :  { %125 = vst [vmem:[#allocation8] sm:$0xff] %v124_v15 }
 0x197   :  { %217 = shalt.err (!%p214_p6)
}
 0x198   :  { %s218_s26 = scalar_lea.hbm %s328_s5, 128 }
 0x199   :  { %p219_p7 = scmp.ne.s32.totalorder %s328_s5, %s218_s26  ;;  %p222_p8 = scmp.lt.u32.totalorder %s218_s26, %s328_s5 }
 0x19b   :  { %p224_p9 = pnand %p222_p8, %p219_p7 }
 0x19d   :  { %227 = shalt.err (!%p224_p9)
}
 0x19e   :  { %135 = dma.vmem_to_hbm [thread:$0]  %s133_s2, 128, %s328_s5, [#allocation5]  }
 0x19f   :  { %232 = dma.done.wait [#allocation5], 128  }
 0x1a0   :  { %233 = vsyncadd [#allocation5], 4294967168 }
 0x1a1   :  { %139 = vsyncpa [#allocation4], 1 }
 0x1a2   :  { %140 = vsyncpa [#allocation7], 1 }
 0x1a3   :  { %141 = vsyncpa [#allocation5], 1 }

</bundles_post_ra>
